<compile_context>
chip_gen: v7x
topology: tpu7x:2x2x1
jax: 0.10.0
libtpu: 0.0.40
codegen_flags: <defaults>
</compile_context>

<pallas_src>
import jax
import jax.numpy as jnp
from jax import lax
from jax.experimental import pallas as pl
from jax.experimental.pallas import tpu as pltpu


def _round_up(x: int, m: int) -> int:
    return ((x + m - 1) // m) * m


def _vmem_limit_bytes() -> int:
    """~75% of the physical per-core VMEM (v5e/v6e 128 MiB, v7x 64 MiB)."""
    try:
        cap = int(pltpu.get_tpu_info().vmem_capacity_bytes)
    except Exception:
        cap = 64 * 1024 * 1024
    return cap * 3 // 4


def _choose_tile(T: int, tm_max: int) -> int:
    """Token tile size.

    Single tile when everything fits (block dims then equal the full array
    dims, so no (8,128) divisibility concern).  When tiling, tm is a multiple
    of 128 (lane-dense output block) and the tile count is made even so v7x's
    two TensorCores both get work on the "parallel" grid axis.
    """
    if T <= tm_max:
        return T
    n = pl.cdiv(T, tm_max)
    if n % 2:
        n += 1
    return _round_up(pl.cdiv(T, n), 128)


def _make_kernel(bf16_tanh: bool):
    def kernel(x_ref, w1_ref, b1_ref, w2t_ref, b2_ref, out_ref):
        """One token tile of the fused ensemble QA head.

        x_ref   : [tm, H]   f32   token tile of inputs_embeds (cast in-kernel)
        w1_ref  : [H, E*H]  bf16  all W1_e concatenated along N
        b1_ref  : [1, E*H]  f32   all b1_e concatenated
        w2t_ref : [2, E*H]  bf16  all W2_e concatenated along K, transposed
        b2_ref  : [2, 1]    f32   sum_e b2_e
        out_ref : [2, tm]   f32   ensemble-summed (start, end) logits, lane-dense
        """
        # In-kernel bf16 cast (VPU, free next to the MXU op) avoids a separate
        # HBM cast pass over the token stream in the wrapper.
        x = x_ref[...].astype(w1_ref.dtype)

        # Wide matmul: every ensemble member's hidden activations at once.
        pre = jnp.dot(x, w1_ref[...], preferred_element_type=jnp.float32)
        if bf16_tanh:
            # v6e/v7x only: bf16 EUP ~doubles tanh throughput and removes the
            # separate pack before the second dot.  Keep f32 path on v5e.
            h = jnp.tanh((pre + b1_ref[...]).astype(jnp.bfloat16))
        else:
            h = jnp.tanh(pre + b1_ref[...]).astype(w2t_ref.dtype)  # [tm, E*H]

        # Lane-dense logits [2, tm]: contract the E*H axes of W2^T and h.
        # The K-reduction over E*H *is* the ensemble sum (no accumulator).
        logits = lax.dot_general(
            w2t_ref[...], h,
            dimension_numbers=(((1,), (1,)), ((), ())),
            preferred_element_type=jnp.float32,
        ) + b2_ref[...]                                            # [2, tm]
        out_ref[...] = logits.astype(out_ref.dtype)

    return kernel


def prepare_ensemble_params(w1, b1, w2, b2, compute_dtype=jnp.bfloat16):
    """Fold the ensemble axis into the matmul shapes (call once per ensemble).

      w1: [E, H, H], b1: [E, H], w2: [E, H, 2], b2: [E, 2]
    Returns W1_all [H, E*H], b1_all [1, E*H], W2T_all [2, E*H], b2_sum [2, 1].
    """
    E, H, _ = w1.shape
    # W1_all[k, e*H + j] = w1[e, k, j]
    w1_all = jnp.transpose(w1, (1, 0, 2)).reshape(H, E * H).astype(compute_dtype)
    b1_all = b1.reshape(1, E * H).astype(jnp.float32)
    # W2T_all[c, e*H + k] = w2[e, k, c]   (lane-dense output layout)
    w2t_all = jnp.transpose(w2, (2, 0, 1)).reshape(2, E * H).astype(compute_dtype)
    b2_sum = jnp.sum(b2.astype(jnp.float32), axis=0).reshape(2, 1)
    return w1_all, b1_all, w2t_all, b2_sum


def ensemble_moe_forward(inputs_embeds, w1_all, b1_all, w2t_all, b2_sum,
                         *, tm_max=1024, bf16_tanh=False):
    """inputs_embeds: [B, S, H] -> (start_logits [B, S], end_logits [B, S]).

    attention_mask / head_mask / input_ids etc. in the PyTorch signature are
    only forwarded to the sub-models there; the synthetic sub-models here
    consume inputs_embeds only.
    """
    B, S, H = inputs_embeds.shape
    EH = w1_all.shape[1]
    T = B * S

    # No cast, no pad: feed the f32 tokens straight in; Pallas masks the
    # ragged last block (each output column depends only on its own x row,
    # and out-of-range columns are never stored).
    x = inputs_embeds.reshape(T, H)

    tm = _choose_tile(T, tm_max)
    n_tiles = pl.cdiv(T, tm)
    kernel = _make_kernel(bf16_tanh)

    def _run(single_buffer_weights: bool):
        def const_spec(shape):
            # Constant-index blocks: fetched once; single-buffering halves
            # their VMEM residency (matters on v7x's 64 MiB budget).
            if single_buffer_weights:
                return pl.BlockSpec(shape, lambda i: (0, 0),
                                    pipeline_mode=pl.Buffered(1))
            return pl.BlockSpec(shape, lambda i: (0, 0))

        return pl.pallas_call(
            kernel,
            out_shape=jax.ShapeDtypeStruct((2, T), jnp.float32),
            grid=(n_tiles,),
            in_specs=[
                pl.BlockSpec((tm, H), lambda i: (i, 0)),   # x token tile (f32)
                const_spec((H, EH)),                       # W1_all
                const_spec((1, EH)),                       # b1_all
                const_spec((2, EH)),                       # W2^T (K-concat)
                const_spec((2, 1)),                        # b2_sum
            ],
            # Lane-dense output: full 128-lane vst, no masked partial stores.
            out_specs=pl.BlockSpec((2, tm), lambda i: (0, i)),
            compiler_params=pltpu.CompilerParams(
                dimension_semantics=("parallel",),
                vmem_limit_bytes=_vmem_limit_bytes(),
            ),
        )(x, w1_all, b1_all, w2t_all, b2_sum)

    try:
        out = _run(True)
    except Exception:
        # Older JAX without single-buffer pipeline_mode support: fall back to
        # default double-buffered constant blocks (correctness identical).
        out = _run(False)

    start_logits = out[0].reshape(B, S)
    end_logits = out[1].reshape(B, S)
    return start_logits, end_logits


def _reference(inputs_embeds, w1, b1, w2, b2, compute_dtype=jnp.float32):
    """Pure-JAX ensemble loop mirroring the PyTorch module.

    compute_dtype rounds the matmul operands (x, W1, h, W2) the same way the
    kernel does; accumulation / biases / tanh stay f32 in both.
    """
    B, S, H = inputs_embeds.shape
    f32 = jnp.float32
    x = inputs_embeds.reshape(B * S, H).astype(compute_dtype).astype(f32)
    start = end = None
    for e in range(w1.shape[0]):
        w1e = w1[e].astype(compute_dtype).astype(f32)
        h = jnp.tanh(x @ w1e + b1[e].astype(f32))
        h = h.astype(compute_dtype).astype(f32)
        w2e = w2[e].astype(compute_dtype).astype(f32)
        logits = h @ w2e + b2[e].astype(f32)
        s, t = logits[:, 0], logits[:, 1]
        if start is None:
            start, end = s, t
        else:
            start, end = start + s, end + t
    return start.reshape(B, S), end.reshape(B, S)


if __name__ == "__main__":
    B, S, H, E = 2, 8, 32, 3  # batch, seq, hidden, ensemble size

    key = jax.random.PRNGKey(0)
    k0, k1, k2, k3, k4 = jax.random.split(key, 5)

    inputs_embeds = jax.random.normal(k0, (B, S, H), jnp.float32)
    w1 = jax.random.normal(k1, (E, H, H), jnp.float32) * (1.0 / jnp.sqrt(H))
    b1 = jax.random.normal(k2, (E, H), jnp.float32) * 0.02
    w2 = jax.random.normal(k3, (E, H, 2), jnp.float32) * (1.0 / jnp.sqrt(H))
    b2 = jax.random.normal(k4, (E, 2), jnp.float32) * 0.02

    # One-time weight prep (outside the per-token hot path).
    w1_all, b1_all, w2t_all, b2_sum = prepare_ensemble_params(w1, b1, w2, b2)

    start_logits, end_logits = ensemble_moe_forward(
        inputs_embeds, w1_all, b1_all, w2t_all, b2_sum)
    jax.block_until_ready((start_logits, end_logits))

    # Tight check against a reference using the kernel's precision policy
    # (bf16 matmul operands, f32 accumulation / bias / tanh).
    ref_bs, ref_be = _reference(inputs_embeds, w1, b1, w2, b2,
                                compute_dtype=jnp.bfloat16)
    assert jnp.allclose(start_logits, ref_bs, atol=5e-3, rtol=5e-3)
    assert jnp.allclose(end_logits, ref_be, atol=5e-3, rtol=5e-3)

    # Looser check against the pure-f32 ensemble loop (PyTorch semantics).
    ref_fs, ref_fe = _reference(inputs_embeds, w1, b1, w2, b2,
                                compute_dtype=jnp.float32)
    assert jnp.allclose(start_logits, ref_fs, atol=5e-2, rtol=5e-2)
    assert jnp.allclose(end_logits, ref_fe, atol=5e-2, rtol=5e-2)

    # TODO(synk): start_positions/end_positions loss path and the pass-through
    # of attention_mask/head_mask to real sub-models are not modeled here.
    print("KERNEL_OK")
</pallas_src>

<mosaic_0001>
module attributes {stable_mosaic.version = 11 : i64} {
  func.func @kernel(%arg0: i32, %arg1: memref<16x32xf32, #tpu.memory_space<vmem>>, %arg2: memref<32x96xbf16, #tpu.memory_space<vmem>>, %arg3: memref<1x96xf32, #tpu.memory_space<vmem>>, %arg4: memref<2x96xbf16, #tpu.memory_space<vmem>>, %arg5: memref<2x1xf32, #tpu.memory_space<vmem>>, %arg6: memref<2x16xf32, #tpu.memory_space<vmem>>) attributes {dimension_semantics = [#tpu.dimension_semantics<parallel>], iteration_bounds = array<i64: 1>, scalar_prefetch = 0 : i64, scratch_operands = 0 : i64, tpu.core_type = #tpu.core_type<tc>, window_params = [{transform_indices = @transform_0, window_bounds = array<i64: 16, 32>}, {pipeline_mode = #tpu.pipeline_mode<synchronous>, transform_indices = @transform_1, window_bounds = array<i64: 32, 96>}, {pipeline_mode = #tpu.pipeline_mode<synchronous>, transform_indices = @transform_2, window_bounds = array<i64: 1, 96>}, {pipeline_mode = #tpu.pipeline_mode<synchronous>, transform_indices = @transform_3, window_bounds = array<i64: 2, 96>}, {pipeline_mode = #tpu.pipeline_mode<synchronous>, transform_indices = @transform_4, window_bounds = array<i64: 2, 1>}, {transform_indices = @transform_5, window_bounds = array<i64: 2, 16>}]} {
    %c0 = arith.constant 0 : index
    %c0_0 = arith.constant 0 : index
    %0 = vector.load %arg1[%c0, %c0_0] : memref<16x32xf32, #tpu.memory_space<vmem>>, vector<16x32xf32>
    %1 = arith.truncf %0 : vector<16x32xf32> to vector<16x32xbf16>
    %c0_1 = arith.constant 0 : index
    %c0_2 = arith.constant 0 : index
    %2 = vector.load %arg2[%c0_1, %c0_2] : memref<32x96xbf16, #tpu.memory_space<vmem>>, vector<32x96xbf16>
    %cst = arith.constant dense<0.000000e+00> : vector<16x96xf32>
    %3 = tpu.matmul %1, %2, %cst {dimension_numbers = #tpu.dot_dimension_numbers<[1], [0], [0], [1], [0, 0, 1, 1], [], []>} : vector<16x32xbf16>, vector<32x96xbf16>, vector<16x96xf32> -> vector<16x96xf32>
    %c0_3 = arith.constant 0 : index
    %c0_4 = arith.constant 0 : index
    %4 = vector.load %arg3[%c0_3, %c0_4] : memref<1x96xf32, #tpu.memory_space<vmem>>, vector<1x96xf32>
    %5 = vector.broadcast %4 : vector<1x96xf32> to vector<16x96xf32>
    %6 = arith.addf %3, %5 : vector<16x96xf32>
    %7 = math.tanh %6 : vector<16x96xf32>
    %8 = arith.truncf %7 : vector<16x96xf32> to vector<16x96xbf16>
    %c0_5 = arith.constant 0 : index
    %c0_6 = arith.constant 0 : index
    %9 = vector.load %arg4[%c0_5, %c0_6] : memref<2x96xbf16, #tpu.memory_space<vmem>>, vector<2x96xbf16>
    %cst_7 = arith.constant dense<0.000000e+00> : vector<2x16xf32>
    %10 = tpu.matmul %9, %8, %cst_7 {dimension_numbers = #tpu.dot_dimension_numbers<[1], [1], [0], [0], [0, 0, 1, 0], [], []>} : vector<2x96xbf16>, vector<16x96xbf16>, vector<2x16xf32> -> vector<2x16xf32>
    %c0_8 = arith.constant 0 : index
    %c0_9 = arith.constant 0 : index
    %11 = vector.load %arg5[%c0_8, %c0_9] : memref<2x1xf32, #tpu.memory_space<vmem>>, vector<2x1xf32>
    %12 = vector.broadcast %11 : vector<2x1xf32> to vector<2x16xf32>
    %13 = arith.addf %10, %12 : vector<2x16xf32>
    %c0_10 = arith.constant 0 : index
    %c0_11 = arith.constant 0 : index
    %14 = vector.load %arg6[%c0_10, %c0_11] : memref<2x16xf32, #tpu.memory_space<vmem>>, vector<2x16xf32>
    tpu.vector_store %arg6[%c0_10, %c0_11], %13 {strides = array<i32>} : memref<2x16xf32, #tpu.memory_space<vmem>>, vector<2x16xf32>,
    return
  }
  func.func @transform_0(%arg0: i32) -> (i32, i32) {
    %c0_i32 = arith.constant 0 : i32
    %c0_i32_0 = arith.constant 0 : i32
    return %arg0, %c0_i32 : i32, i32
  }
  func.func @transform_1(%arg0: i32) -> (i32, i32) {
    %c0_i32 = arith.constant 0 : i32
    %c0_i32_0 = arith.constant 0 : i32
    %c0_i32_1 = arith.constant 0 : i32
    return %c0_i32, %c0_i32_0 : i32, i32
  }
  func.func @transform_2(%arg0: i32) -> (i32, i32) {
    %c0_i32 = arith.constant 0 : i32
    %c0_i32_0 = arith.constant 0 : i32
    %c0_i32_1 = arith.constant 0 : i32
    return %c0_i32, %c0_i32_0 : i32, i32
  }
  func.func @transform_3(%arg0: i32) -> (i32, i32) {
    %c0_i32 = arith.constant 0 : i32
    %c0_i32_0 = arith.constant 0 : i32
    %c0_i32_1 = arith.constant 0 : i32
    return %c0_i32, %c0_i32_0 : i32, i32
  }
  func.func @transform_4(%arg0: i32) -> (i32, i32) {
    %c0_i32 = arith.constant 0 : i32
    %c0_i32_0 = arith.constant 0 : i32
    %c0_i32_1 = arith.constant 0 : i32
    return %c0_i32, %c0_i32_0 : i32, i32
  }
  func.func @transform_5(%arg0: i32) -> (i32, i32) {
    %c0_i32 = arith.constant 0 : i32
    %c0_i32_0 = arith.constant 0 : i32
    return %c0_i32, %arg0 : i32, i32
  }
}

module attributes {stable_mosaic.version = 11 : i64} {
  func.func @kernel(%arg0: i32, %arg1: memref<16x32xf32, #tpu.memory_space<vmem>>, %arg2: memref<32x96xbf16, #tpu.memory_space<vmem>>, %arg3: memref<1x96xf32, #tpu.memory_space<vmem>>, %arg4: memref<2x96xbf16, #tpu.memory_space<vmem>>, %arg5: memref<2x1xf32, #tpu.memory_space<vmem>>, %arg6: memref<2x16xf32, #tpu.memory_space<vmem>>) attributes {dimension_semantics = [#tpu.dimension_semantics<parallel>], iteration_bounds = array<i64: 1>, scalar_prefetch = 0 : i64, scratch_operands = 0 : i64, tpu.core_type = #tpu.core_type<tc>, window_params = [{transform_indices = @transform_0, window_bounds = array<i64: 16, 32>}, {pipeline_mode = #tpu.pipeline_mode<synchronous>, transform_indices = @transform_1, window_bounds = array<i64: 32, 96>}, {pipeline_mode = #tpu.pipeline_mode<synchronous>, transform_indices = @transform_2, window_bounds = array<i64: 1, 96>}, {pipeline_mode = #tpu.pipeline_mode<synchronous>, transform_indices = @transform_3, window_bounds = array<i64: 2, 96>}, {pipeline_mode = #tpu.pipeline_mode<synchronous>, transform_indices = @transform_4, window_bounds = array<i64: 2, 1>}, {transform_indices = @transform_5, window_bounds = array<i64: 2, 16>}]} {
    %c0 = arith.constant 0 : index
    %c0_0 = arith.constant 0 : index
    %0 = vector.load %arg1[%c0, %c0_0] : memref<16x32xf32, #tpu.memory_space<vmem>>, vector<16x32xf32>
    %1 = arith.truncf %0 : vector<16x32xf32> to vector<16x32xbf16>
    %c0_1 = arith.constant 0 : index
    %c0_2 = arith.constant 0 : index
    %2 = vector.load %arg2[%c0_1, %c0_2] : memref<32x96xbf16, #tpu.memory_space<vmem>>, vector<32x96xbf16>
    %cst = arith.constant dense<0.000000e+00> : vector<16x96xf32>
    %3 = tpu.matmul %1, %2, %cst {dimension_numbers = #tpu.dot_dimension_numbers<[1], [0], [0], [1], [0, 0, 1, 1], [], []>} : vector<16x32xbf16>, vector<32x96xbf16>, vector<16x96xf32> -> vector<16x96xf32>
    %c0_3 = arith.constant 0 : index
    %c0_4 = arith.constant 0 : index
    %4 = vector.load %arg3[%c0_3, %c0_4] : memref<1x96xf32, #tpu.memory_space<vmem>>, vector<1x96xf32>
    %5 = vector.broadcast %4 : vector<1x96xf32> to vector<16x96xf32>
    %6 = arith.addf %3, %5 : vector<16x96xf32>
    %7 = math.tanh %6 : vector<16x96xf32>
    %8 = arith.truncf %7 : vector<16x96xf32> to vector<16x96xbf16>
    %c0_5 = arith.constant 0 : index
    %c0_6 = arith.constant 0 : index
    %9 = vector.load %arg4[%c0_5, %c0_6] : memref<2x96xbf16, #tpu.memory_space<vmem>>, vector<2x96xbf16>
    %cst_7 = arith.constant dense<0.000000e+00> : vector<2x16xf32>
    %10 = tpu.matmul %9, %8, %cst_7 {dimension_numbers = #tpu.dot_dimension_numbers<[1], [1], [0], [0], [0, 0, 1, 0], [], []>} : vector<2x96xbf16>, vector<16x96xbf16>, vector<2x16xf32> -> vector<2x16xf32>
    %c0_8 = arith.constant 0 : index
    %c0_9 = arith.constant 0 : index
    %11 = vector.load %arg5[%c0_8, %c0_9] : memref<2x1xf32, #tpu.memory_space<vmem>>, vector<2x1xf32>
    %12 = vector.broadcast %11 : vector<2x1xf32> to vector<2x16xf32>
    %13 = arith.addf %10, %12 : vector<2x16xf32>
    %c0_10 = arith.constant 0 : index
    %c0_11 = arith.constant 0 : index
    %14 = vector.load %arg6[%c0_10, %c0_11] : memref<2x16xf32, #tpu.memory_space<vmem>>, vector<2x16xf32>
    tpu.vector_store %arg6[%c0_10, %c0_11], %13 {strides = array<i32>} : memref<2x16xf32, #tpu.memory_space<vmem>>, vector<2x16xf32>,
    return
  }
  func.func @transform_0(%arg0: i32) -> (i32, i32) {
    %c0_i32 = arith.constant 0 : i32
    %c0_i32_0 = arith.constant 0 : i32
    return %arg0, %c0_i32 : i32, i32
  }
  func.func @transform_1(%arg0: i32) -> (i32, i32) {
    %c0_i32 = arith.constant 0 : i32
    %c0_i32_0 = arith.constant 0 : i32
    %c0_i32_1 = arith.constant 0 : i32
    return %c0_i32, %c0_i32_0 : i32, i32
  }
  func.func @transform_2(%arg0: i32) -> (i32, i32) {
    %c0_i32 = arith.constant 0 : i32
    %c0_i32_0 = arith.constant 0 : i32
    %c0_i32_1 = arith.constant 0 : i32
    return %c0_i32, %c0_i32_0 : i32, i32
  }
  func.func @transform_3(%arg0: i32) -> (i32, i32) {
    %c0_i32 = arith.constant 0 : i32
    %c0_i32_0 = arith.constant 0 : i32
    %c0_i32_1 = arith.constant 0 : i32
    return %c0_i32, %c0_i32_0 : i32, i32
  }
  func.func @transform_4(%arg0: i32) -> (i32, i32) {
    %c0_i32 = arith.constant 0 : i32
    %c0_i32_0 = arith.constant 0 : i32
    %c0_i32_1 = arith.constant 0 : i32
    return %c0_i32, %c0_i32_0 : i32, i32
  }
  func.func @transform_5(%arg0: i32) -> (i32, i32) {
    %c0_i32 = arith.constant 0 : i32
    %c0_i32_0 = arith.constant 0 : i32
    return %c0_i32, %arg0 : i32, i32
  }
}

</mosaic_0001>

<bundles_post_ra>
// kernel: tpu_custom_call.1
= control target key start
LH: loop header
LB: loop body
LE: loop exit
PB: predicated region body
PF: predicated region fallthrough
CT: control target
= control target key end

     0   :  { %10 = vsyncpa [#allocation3], 0  ;;  %s394_s0 = inlined_call_operand.hbm [shape: f32[16,32], index: 0, kind: input, shape index: {}]   ;;  %s395_s1 = inlined_call_operand.hbm [shape: bf16[32,96], index: 1, kind: input, shape index: {}]   ;;  %s396_s2 = inlined_call_operand.vmem [shape: f32[1,96], index: 2, kind: input, shape index: {}]   ;;  %s397_s3 = inlined_call_operand.vmem [shape: bf16[2,96], index: 3, kind: input, shape index: {}]   ;;  %s398_s4 = inlined_call_operand.vmem [shape: f32[2,1], index: 4, kind: input, shape index: {}]   ;;  %s399_s5 = inlined_call_operand.hbm [shape: f32[2,16], index: 5, kind: output, shape index: {}]  }
   0x1   :  { %11 = vsyncpa [#allocation6], 0 }
   0x2   :  { %12 = vsyncpa [#allocation4], 0  ;;  %s309_s18 = smov [#allocation2]   ;;  %s237_s22 = scalar_lea.hbm %s394_s0, 256 }
   0x3   :  { %s18_s19 = sshll.u32 %s309_s18, 4  ;;  %p238_p0 = scmp.ne.s32.totalorder %s394_s0, %s237_s22  ;;  %s19_s19 = int_to_ptr.vmem [resolvable:$true] %s18_s19 }
   0x4   :  { %p241_p1 = scmp.lt.u32.totalorder %s237_s22, %s394_s0 }
   0x6   :  { %p243_p2 = pnand %p241_p1, %p238_p0 }
   0x8   :  { %246 = shalt.err (!%p243_p2)
}
   0x9   :  { %s247_s27 = scalar_lea.vmem %s19_s19, 256  ;;  %p252_p4 = scmp.lt.s32.totalorder %s19_s19, %s19_s19 }
   0xa   :  { %p248_p3 = scmp.ne.s32.totalorder %s19_s19, %s247_s27  ;;  %p253_p5 = scmp.lt.s32.totalorder %s247_s27, %s247_s27 }
   0xc   :  { %p254_p6 = por %p253_p5, %p252_p4 }
   0xe   :  { %p255_p7 = pnand %p254_p6, %p248_p3 }
  0x10   :  { %258 = shalt.err (!%p255_p7)
}
  0x11   :  { %s310_s28 = smov 128   ;;  %s311_s29 = smov 8  }
  0x12   :  { %24 = dma.hbm_to_vmem [thread:$0]  %s394_s0, 256, %s19_s19, [#allocation3], %s310_s28, %s310_s28, %s311_s29  }
  0x13   :  { %s312_s7 = smov [#allocation5]   ;;  %s259_s11 = scalar_lea.hbm %s395_s1, 256 }
  0x14   :  { %s30_s8 = sshll.u32 %s312_s7, 4  ;;  %p260_p8 = scmp.ne.s32.totalorder %s395_s1, %s259_s11  ;;  %s31_s8 = int_to_ptr.vmem [resolvable:$true] %s30_s8 }
  0x15   :  { %p263_p9 = scmp.lt.u32.totalorder %s259_s11, %s395_s1 }
  0x17   :  { %p265_p10 = pnand %p263_p9, %p260_p8 }
  0x19   :  { %268 = shalt.err (!%p265_p10)
}
  0x1a   :  { %s269_s16 = scalar_lea.vmem %s31_s8, 256  ;;  %p274_p12 = scmp.lt.s32.totalorder %s31_s8, %s31_s8 }
  0x1b   :  { %p270_p11 = scmp.ne.s32.totalorder %s31_s8, %s269_s16  ;;  %p275_p13 = scmp.lt.s32.totalorder %s269_s16, %s269_s16 }
  0x1d   :  { %p276_p0 = por %p275_p13, %p274_p12 }
  0x1f   :  { %p277_p1 = pnand %p276_p0, %p270_p11 }
  0x21   :  { %280 = shalt.err (!%p277_p1)
}
  0x22   :  { %s313_s0 = smov 64   ;;  %s314_s17 = smov 4  }
  0x23   :  { %36 = dma.hbm_to_vmem [thread:$0]  %s395_s1, 256, %s31_s8, [#allocation6], %s313_s0, %s313_s0, %s314_s17  }
  0x24   :  { %303 = dma.done.wait [#allocation3], 256  }
  0x25   :  { %304 = vsyncadd [#allocation3], 4294967040 }
  0x26   :  { %305 = dma.done.wait [#allocation6], 256  }
  0x27   :  { %306 = vsyncadd [#allocation6], 4294967040  ;;  %v315_v0 = vmov 0.0   ;;  %vm316_vm0 = vmmov 0   ;;  %v231_v1 = vld [vmem:[#allocation5] sm:$0xff]   ;;  %v232_v2 = vld [vmem:[#allocation5 + $0x8] sm:$0xff]  }
  0x28   :  { %206 = vmatprep.subr.bf16.mxu0 %v315_v0  ;;  %210 = vmatprep.mubr.msk.bf16.mxu0 %vm316_vm0, %v315_v0  ;;  %v50_v3 = vld [vmem:[#allocation2] sm:$0xff]  ;;  %v51_v4 = vld [vmem:[#allocation2 + $0x8] sm:$0xff]  ;;  %vm76_vm1 = vcmask 261120   ;;  %v317_v7 = vmov 0   ;;  %vm131_vm2 = vcmask 785408   ;;  %vm178_vm3 = vcmask 123904  }
  0x29   :  { %214 = vmatprep.subr.bf16.mxu1 %v315_v0  ;;  %216 = vmatprep.mubr.msk.bf16.mxu1 %vm316_vm0, %v315_v0  ;;  %v52_v5 = vpack.c.bf16 %v51_v4, %v50_v3  ;;  %v125_v6 = vld [vmem:[%s398_s4] sm:$0x3] }
  0x2a   :  { %207 = vmatpush3.bf16.msra.mxu0 %v231_v1  ;;  %230 = vset.pattern.permute.xlu0 %v317_v7  ;;  %v196_v8 = vld [vmem:[%s396_s2] ss:$0 sm:$0xff]  ;;  %s318_s2 = smov [#allocation7]  }
  0x2b   :  { %208 = vmatprep.subr.bf16.mxu0 %v315_v0  ;;  %128 = vperm.xlu0 %230, %v125_v6   ;;  %v124_v19 = vld [vmem:[%s397_s3] sm:$0x1]  ;;  %s186_s24 = sshll.u32 %s318_s2, 4  ;;  %s187_s24 = int_to_ptr.vmem [resolvable:$true] %s186_s24 }
  0x2c   :  { %s281_s25 = scalar_lea.vmem %s187_s24, 32  ;;  %p286_p3 = scmp.lt.s32.totalorder %s187_s24, %s187_s24 }
  0x2d   :  { %p282_p2 = scmp.ne.s32.totalorder %s187_s24, %s281_s25  ;;  %p287_p4 = scmp.lt.s32.totalorder %s281_s25, %s281_s25 }
  0x2e   :  { %209 = vmatpush3.bf16.msra.mxu0 %v232_v2 }
  0x2f   :  { %p288_p5 = por %p287_p4, %p286_p3 }
  0x31   :  { %211 = vmatmul.mubr.msk.bf16.vlgmr.msra.gmra.mrb[0].mxu0 %vm76_vm1, %v52_v5  ;;  %p289_p6 = pnand %p288_p5, %p282_p2 }
  0xaa   :  { %v129_v20 = vpop.permute.xlu0 %128 }
 0x104   :  { %v114_v9 = vpop.f32.mrb[0].mxu0 }
 0x105   :  { %v115_v10 = vadd.f32 %v196_v8, %v114_v9  ;;  %v212_v11 = vpop.f32.mrb[1].mxu0 }
 0x106   :  { %v117_v12 = vpop.f32.mrb[2].mxu0 }
 0x107   :  { %v118_v13 = vadd.f32 %v196_v8, %v117_v12  ;;  %v213_v14 = vpop.f32.mrb[3].mxu0  ;;  %233 = vtanh.f32 %v115_v10 }
 0x109   :  { %235 = vtanh.f32 %v118_v13 }
 0x111   :  { %v234_v15 = vpop.eup %233 }
 0x113   :  { %v236_v16 = vpop.eup %235 }
 0x114   :  { %v123_v17 = vpack.c.bf16 %v236_v16, %v234_v15 }
 0x116   :  { %v136_v18 = vsel %vm131_vm2, %v123_v17, 0 }
 0x117   :  { %215 = vmatpush3.bf16.xpose.msra.mxu1 %v136_v18 }
 0x11e   :  { %217 = vmatmul.mubr.msk.bf16.vlgmr.msra.gmra.mrb[0].mxu1 %vm131_vm2, %v124_v19 }
 0x1f1   :  { %v172_v21 = vpop.f32.mrb[0].mxu1 }
 0x1f2   :  { %v173_v22 = vadd.f32 %v172_v21, %v129_v20  ;;  %v218_v23 = vpop.f32.mrb[1].mxu1 }
 0x1f3   :  { %v175_v24 = vpop.f32.mrb[2].mxu1 }
 0x1f4   :  { %v219_v25 = vpop.f32.mrb[3].mxu1  ;;  %179 = vst.msk [vmem:[#allocation7] sm:$0x3] %vm178_vm3, %v173_v22 }
 0x1f5   :  { %292 = shalt.err (!%p289_p6)
}
 0x1f6   :  { %s293_s27 = scalar_lea.hbm %s399_s5, 32 }
 0x1f7   :  { %p294_p7 = scmp.ne.s32.totalorder %s399_s5, %s293_s27  ;;  %p297_p8 = scmp.lt.u32.totalorder %s293_s27, %s399_s5 }
 0x1f9   :  { %p299_p9 = pnand %p297_p8, %p294_p7 }
 0x1fb   :  { %302 = shalt.err (!%p299_p9)
}
 0x1fc   :  { %189 = dma.vmem_to_hbm [thread:$0]  %s187_s24, 32, %s399_s5, [#allocation4]  }
 0x1fd   :  { %307 = dma.done.wait [#allocation4], 32  }
 0x1fe   :  { %308 = vsyncadd [#allocation4], 4294967264 }
 0x1ff   :  { %193 = vsyncpa [#allocation3], 1 }
 0x200   :  { %194 = vsyncpa [#allocation6], 1 }
 0x201   :  { %195 = vsyncpa [#allocation4], 1 }

// kernel: tpu_custom_call.1
= control target key start
LH: loop header
LB: loop body
LE: loop exit
PB: predicated region body
PF: predicated region fallthrough
CT: control target
= control target key end

     0   :  { %10 = vsyncpa [#allocation3], 0  ;;  %s394_s0 = inlined_call_operand.hbm [shape: f32[16,32], index: 0, kind: input, shape index: {}]   ;;  %s395_s1 = inlined_call_operand.hbm [shape: bf16[32,96], index: 1, kind: input, shape index: {}]   ;;  %s396_s2 = inlined_call_operand.vmem [shape: f32[1,96], index: 2, kind: input, shape index: {}]   ;;  %s397_s3 = inlined_call_operand.vmem [shape: bf16[2,96], index: 3, kind: input, shape index: {}]   ;;  %s398_s4 = inlined_call_operand.vmem [shape: f32[2,1], index: 4, kind: input, shape index: {}]   ;;  %s399_s5 = inlined_call_operand.hbm [shape: f32[2,16], index: 5, kind: output, shape index: {}]  }
   0x1   :  { %11 = vsyncpa [#allocation6], 0 }
   0x2   :  { %12 = vsyncpa [#allocation4], 0  ;;  %s309_s18 = smov [#allocation2]   ;;  %s237_s22 = scalar_lea.hbm %s394_s0, 256 }
   0x3   :  { %s18_s19 = sshll.u32 %s309_s18, 4  ;;  %p238_p0 = scmp.ne.s32.totalorder %s394_s0, %s237_s22  ;;  %s19_s19 = int_to_ptr.vmem [resolvable:$true] %s18_s19 }
   0x4   :  { %p241_p1 = scmp.lt.u32.totalorder %s237_s22, %s394_s0 }
   0x6   :  { %p243_p2 = pnand %p241_p1, %p238_p0 }
   0x8   :  { %246 = shalt.err (!%p243_p2)
}
   0x9   :  { %s247_s27 = scalar_lea.vmem %s19_s19, 256  ;;  %p252_p4 = scmp.lt.s32.totalorder %s19_s19, %s19_s19 }
   0xa   :  { %p248_p3 = scmp.ne.s32.totalorder %s19_s19, %s247_s27  ;;  %p253_p5 = scmp.lt.s32.totalorder %s247_s27, %s247_s27 }
   0xc   :  { %p254_p6 = por %p253_p5, %p252_p4 }
   0xe   :  { %p255_p7 = pnand %p254_p6, %p248_p3 }
  0x10   :  { %258 = shalt.err (!%p255_p7)
}
  0x11   :  { %s310_s28 = smov 128   ;;  %s311_s29 = smov 8  }
  0x12   :  { %24 = dma.hbm_to_vmem [thread:$0]  %s394_s0, 256, %s19_s19, [#allocation3], %s310_s28, %s310_s28, %s311_s29  }
  0x13   :  { %s312_s7 = smov [#allocation5]   ;;  %s259_s11 = scalar_lea.hbm %s395_s1, 256 }
  0x14   :  { %s30_s8 = sshll.u32 %s312_s7, 4  ;;  %p260_p8 = scmp.ne.s32.totalorder %s395_s1, %s259_s11  ;;  %s31_s8 = int_to_ptr.vmem [resolvable:$true] %s30_s8 }
  0x15   :  { %p263_p9 = scmp.lt.u32.totalorder %s259_s11, %s395_s1 }
  0x17   :  { %p265_p10 = pnand %p263_p9, %p260_p8 }
  0x19   :  { %268 = shalt.err (!%p265_p10)
}
  0x1a   :  { %s269_s16 = scalar_lea.vmem %s31_s8, 256  ;;  %p274_p12 = scmp.lt.s32.totalorder %s31_s8, %s31_s8 }
  0x1b   :  { %p270_p11 = scmp.ne.s32.totalorder %s31_s8, %s269_s16  ;;  %p275_p13 = scmp.lt.s32.totalorder %s269_s16, %s269_s16 }
  0x1d   :  { %p276_p0 = por %p275_p13, %p274_p12 }
  0x1f   :  { %p277_p1 = pnand %p276_p0, %p270_p11 }
  0x21   :  { %280 = shalt.err (!%p277_p1)
}
  0x22   :  { %s313_s0 = smov 64   ;;  %s314_s17 = smov 4  }
  0x23   :  { %36 = dma.hbm_to_vmem [thread:$0]  %s395_s1, 256, %s31_s8, [#allocation6], %s313_s0, %s313_s0, %s314_s17  }
  0x24   :  { %303 = dma.done.wait [#allocation3], 256  }
  0x25   :  { %304 = vsyncadd [#allocation3], 4294967040 }
  0x26   :  { %305 = dma.done.wait [#allocation6], 256  }
  0x27   :  { %306 = vsyncadd [#allocation6], 4294967040  ;;  %v315_v0 = vmov 0.0   ;;  %vm316_vm0 = vmmov 0   ;;  %v231_v1 = vld [vmem:[#allocation5] sm:$0xff]   ;;  %v232_v2 = vld [vmem:[#allocation5 + $0x8] sm:$0xff]  }
  0x28   :  { %206 = vmatprep.subr.bf16.mxu0 %v315_v0  ;;  %210 = vmatprep.mubr.msk.bf16.mxu0 %vm316_vm0, %v315_v0  ;;  %v50_v3 = vld [vmem:[#allocation2] sm:$0xff]  ;;  %v51_v4 = vld [vmem:[#allocation2 + $0x8] sm:$0xff]  ;;  %vm76_vm1 = vcmask 261120   ;;  %v317_v7 = vmov 0   ;;  %vm131_vm2 = vcmask 785408   ;;  %vm178_vm3 = vcmask 123904  }
  0x29   :  { %214 = vmatprep.subr.bf16.mxu1 %v315_v0  ;;  %216 = vmatprep.mubr.msk.bf16.mxu1 %vm316_vm0, %v315_v0  ;;  %v52_v5 = vpack.c.bf16 %v51_v4, %v50_v3  ;;  %v125_v6 = vld [vmem:[%s398_s4] sm:$0x3] }
  0x2a   :  { %207 = vmatpush3.bf16.msra.mxu0 %v231_v1  ;;  %230 = vset.pattern.permute.xlu0 %v317_v7  ;;  %v196_v8 = vld [vmem:[%s396_s2] ss:$0 sm:$0xff]  ;;  %s318_s2 = smov [#allocation7]  }
  0x2b   :  { %208 = vmatprep.subr.bf16.mxu0 %v315_v0  ;;  %128 = vperm.xlu0 %230, %v125_v6   ;;  %v124_v19 = vld [vmem:[%s397_s3] sm:$0x1]  ;;  %s186_s24 = sshll.u32 %s318_s2, 4  ;;  %s187_s24 = int_to_ptr.vmem [resolvable:$true] %s186_s24 }
  0x2c   :  { %s281_s25 = scalar_lea.vmem %s187_s24, 32  ;;  %p286_p3 = scmp.lt.s32.totalorder %s187_s24, %s187_s24 }
  0x2d   :  { %p282_p2 = scmp.ne.s32.totalorder %s187_s24, %s281_s25  ;;  %p287_p4 = scmp.lt.s32.totalorder %s281_s25, %s281_s25 }
  0x2e   :  { %209 = vmatpush3.bf16.msra.mxu0 %v232_v2 }
  0x2f   :  { %p288_p5 = por %p287_p4, %p286_p3 }
  0x31   :  { %211 = vmatmul.mubr.msk.bf16.vlgmr.msra.gmra.mrb[0].mxu0 %vm76_vm1, %v52_v5  ;;  %p289_p6 = pnand %p288_p5, %p282_p2 }
  0xaa   :  { %v129_v20 = vpop.permute.xlu0 %128 }
 0x104   :  { %v114_v9 = vpop.f32.mrb[0].mxu0 }
 0x105   :  { %v115_v10 = vadd.f32 %v196_v8, %v114_v9  ;;  %v212_v11 = vpop.f32.mrb[1].mxu0 }
 0x106   :  { %v117_v12 = vpop.f32.mrb[2].mxu0 }
 0x107   :  { %v118_v13 = vadd.f32 %v196_v8, %v117_v12  ;;  %v213_v14 = vpop.f32.mrb[3].mxu0  ;;  %233 = vtanh.f32 %v115_v10 }
 0x109   :  { %235 = vtanh.f32 %v118_v13 }
 0x111   :  { %v234_v15 = vpop.eup %233 }
 0x113   :  { %v236_v16 = vpop.eup %235 }
 0x114   :  { %v123_v17 = vpack.c.bf16 %v236_v16, %v234_v15 }
 0x116   :  { %v136_v18 = vsel %vm131_vm2, %v123_v17, 0 }
 0x117   :  { %215 = vmatpush3.bf16.xpose.msra.mxu1 %v136_v18 }
 0x11e   :  { %217 = vmatmul.mubr.msk.bf16.vlgmr.msra.gmra.mrb[0].mxu1 %vm131_vm2, %v124_v19 }
 0x1f1   :  { %v172_v21 = vpop.f32.mrb[0].mxu1 }
 0x1f2   :  { %v173_v22 = vadd.f32 %v172_v21, %v129_v20  ;;  %v218_v23 = vpop.f32.mrb[1].mxu1 }
 0x1f3   :  { %v175_v24 = vpop.f32.mrb[2].mxu1 }
 0x1f4   :  { %v219_v25 = vpop.f32.mrb[3].mxu1  ;;  %179 = vst.msk [vmem:[#allocation7] sm:$0x3] %vm178_vm3, %v173_v22 }
 0x1f5   :  { %292 = shalt.err (!%p289_p6)
}
 0x1f6   :  { %s293_s27 = scalar_lea.hbm %s399_s5, 32 }
 0x1f7   :  { %p294_p7 = scmp.ne.s32.totalorder %s399_s5, %s293_s27  ;;  %p297_p8 = scmp.lt.u32.totalorder %s293_s27, %s399_s5 }
 0x1f9   :  { %p299_p9 = pnand %p297_p8, %p294_p7 }
 0x1fb   :  { %302 = shalt.err (!%p299_p9)
}
 0x1fc   :  { %189 = dma.vmem_to_hbm [thread:$0]  %s187_s24, 32, %s399_s5, [#allocation4]  }
 0x1fd   :  { %307 = dma.done.wait [#allocation4], 32  }
 0x1fe   :  { %308 = vsyncadd [#allocation4], 4294967264 }
 0x1ff   :  { %193 = vsyncpa [#allocation3], 1 }
 0x200   :  { %194 = vsyncpa [#allocation6], 1 }
 0x201   :  { %195 = vsyncpa [#allocation4], 1 }

</bundles_post_ra>
